<compile_context>
chip_gen: v5e
topology: v5e:2x2
jax: 0.10.0
libtpu: 0.0.40
codegen_flags: <defaults>
</compile_context>

<pallas_src>
import functools

import jax
import jax.numpy as jnp
from jax.experimental import pallas as pl
from jax.experimental.pallas import tpu as pltpu


def _accuracy_kernel(audio_ref, text_ref, out_ref, *, ks, tm, n_total, temp_scale):
    """audio_ref: [TM, D] (native dtype), text_ref: [N, D] (native dtype, resident),
    out_ref: [1, 8, 128] f32 VMEM block -> per-tile counts in lanes 0..len(ks)-1 of row 0."""
    i = pl.program_id(0)
    row_start = i * tm

    audio = audio_ref[...]          # [TM, D] native dtype (bf16 feeds MXU directly)
    text = text_ref[...]            # [N,  D]

    # logits tile = audio @ text.T  -> [TM, N], f32 accumulation on the MXU.
    logits = jax.lax.dot_general(
        audio, text, (((1,), (1,)), ((), ())),
        preferred_element_type=jnp.float32)

    # Rank is invariant under a positive uniform scale; only apply the temperature
    # when it is non-positive (statically decided in the wrapper).
    if temp_scale is not None:
        logits = logits * jnp.float32(temp_scale)

    n_cols = logits.shape[1]
    col_ids = jax.lax.broadcasted_iota(jnp.int32, (tm, n_cols), 1)        # [TM, N]
    row_ids = row_start + jax.lax.broadcasted_iota(jnp.int32, (tm, 1), 0)  # [TM, 1]

    # diag[r] = logits[r, row_start + r], extracted from the same logits tile
    # (same accumulation precision -> no self-comparison flips on near-ties).
    diag = jnp.sum(jnp.where(col_ids == row_ids, logits, jnp.float32(0.0)),
                   axis=-1, keepdims=True)                                 # [TM, 1]

    # rank[r] = #{c : logits[r, c] > diag[r]}   (int32, cast to f32 only at the end)
    num_greater = jnp.sum((logits > diag).astype(jnp.int32),
                          axis=-1, keepdims=True)                          # [TM, 1]

    # Mask padded rows of a ragged last tile.
    valid = row_ids < n_total                                              # [TM, 1]

    # Lane-dense output tile: count for top_k[idx] lives in lane idx.
    lane = jax.lax.broadcasted_iota(jnp.int32, (8, 128), 1)
    out_tile = jnp.zeros((8, 128), jnp.float32)
    for idx, k in enumerate(ks):
        hit = jnp.logical_and(valid, num_greater < k)
        cnt = jnp.sum(hit.astype(jnp.int32)).astype(jnp.float32)
        out_tile = out_tile + jnp.where(lane == idx, cnt, jnp.float32(0.0))
    out_ref[0] = out_tile


def clap_accuracy(text_features, audio_features,
                  text_temperature=1.0, audio_temperature=1.0, top_k=(1,)):
    """Pallas equivalent of Accuracy.forward.

    Returns a device array of shape [len(top_k)] with float32 *counts* (not ratios),
    matching the torch module. Convert with `[float(c) for c in jax.device_get(out)]`
    if a Python list of floats is needed (single host transfer).
    """
    assert text_features.ndim == 2 and audio_features.ndim == 2
    assert text_features.shape == audio_features.shape
    del text_temperature  # logits_per_text never affects the returned accuracy

    n, d = audio_features.shape
    ks = tuple(int(k) for k in top_k)
    assert 1 <= len(ks) <= 128

    # Row tile: 256 keeps the large MXU fed on v6e/v7x (128-aligned is enough on
    # v5e) while the [TM, N] f32 logits tile stays small even on v7x's 64 MiB VMEM.
    tm = n if n <= 256 else 256
    num_tiles = pl.cdiv(n, tm)

    # Positive temperature does not change the ranking -> skip the N^2 multiply.
    temp_scale = None if float(audio_temperature) > 0.0 else float(audio_temperature)

    kernel = functools.partial(_accuracy_kernel, ks=ks, tm=tm, n_total=n,
                               temp_scale=temp_scale)

    itemsize = jnp.dtype(audio_features.dtype).itemsize
    cost = pl.CostEstimate(
        flops=2 * n * n * d,
        transcendentals=0,
        bytes_accessed=2 * n * d * itemsize + num_tiles * 8 * 128 * 4)

    partials = pl.pallas_call(
        kernel,
        out_shape=jax.ShapeDtypeStruct((num_tiles, 8, 128), jnp.float32),
        grid=(num_tiles,),
        in_specs=[
            pl.BlockSpec((tm, d), lambda i: (i, 0)),   # audio row tile (pipelined)
            pl.BlockSpec((n, d), lambda i: (0, 0)),    # text fully resident in VMEM
        ],
        out_specs=pl.BlockSpec((1, 8, 128), lambda i: (i, 0, 0)),
        compiler_params=pltpu.CompilerParams(
            dimension_semantics=("parallel",),          # row tiles shard across TCs (v7x)
            vmem_limit_bytes=48 * 1024 * 1024),
        cost_estimate=cost,
    )(audio_features, text_features)

    # One small on-device reduction over row tiles; result stays on device.
    return partials[:, 0, :len(ks)].sum(axis=0)


def _ref_accuracy(text_features, audio_features, audio_temperature, top_k):
    """Pure-JAX reference mirroring the torch code (topk/argsort based)."""
    logits = audio_temperature * (audio_features.astype(jnp.float32)
                                  @ text_features.astype(jnp.float32).T)
    n = logits.shape[0]
    maxk = max(top_k)
    pred = jnp.argsort(-logits, axis=-1)[:, :maxk].T            # [maxk, N]
    labels = jnp.arange(n)
    correct = (pred == labels[None, :])
    return [float(jnp.sum(correct[:k].astype(jnp.float32))) for k in top_k]


if __name__ == "__main__":
    key = jax.random.PRNGKey(0)
    k_text, k_audio = jax.random.split(key)

    # --- Test 1: small f32 batch checked against a torch-topk-style reference. ---
    N, D = 8, 32
    text_features = jax.random.normal(k_text, (N, D), dtype=jnp.float32)
    audio_features = jax.random.normal(k_audio, (N, D), dtype=jnp.float32)
    top_k = (1, 3)

    counts = jax.block_until_ready(
        clap_accuracy(text_features, audio_features,
                      text_temperature=1.0, audio_temperature=2.0, top_k=top_k))
    counts_host = [float(c) for c in jax.device_get(counts)]
    ref = _ref_accuracy(text_features, audio_features, 2.0, top_k)
    for a, r in zip(counts_host, ref):
        assert abs(a - r) < 1e-3, (counts_host, ref)

    # --- Test 2: multi-tile bf16 path (ragged last tile) with a forced answer. ----
    # Unit-norm rows, text == audio except rows {0, 5, 270} are negated:
    #   -> those 3 rows rank last (only hit for k == N), all others rank first.
    N2, D2 = 272, 128
    a = jax.random.normal(jax.random.PRNGKey(1), (N2, D2), dtype=jnp.float32)
    a = a / jnp.linalg.norm(a, axis=-1, keepdims=True)
    flip = jnp.zeros((N2, 1), jnp.float32).at[jnp.array([0, 5, 270])].set(1.0)
    t = a * (1.0 - 2.0 * flip)
    audio2 = a.astype(jnp.bfloat16)
    text2 = t.astype(jnp.bfloat16)

    counts2 = jax.block_until_ready(
        clap_accuracy(text2, audio2, audio_temperature=0.5, top_k=(1, N2)))
    c2 = [float(x) for x in jax.device_get(counts2)]
    assert abs(c2[0] - (N2 - 3)) < 1e-3, c2
    assert abs(c2[1] - N2) < 1e-3, c2

    # TODO(synk): cache_labels/prev_num_logits is host-side label caching with no
    # device-compute analogue (labels are implicit arange(N) in the kernel).
    print("KERNEL_OK")
</pallas_src>

<mosaic_0001>
module attributes {stable_mosaic.version = 11 : i64} {
  func.func @_accuracy_kernel(%arg0: i32, %arg1: memref<8x32xf32, #tpu.memory_space<vmem>>, %arg2: memref<8x32xf32, #tpu.memory_space<vmem>>, %arg3: memref<1x8x128xf32, #tpu.memory_space<vmem>>) attributes {dimension_semantics = [#tpu.dimension_semantics<parallel>], iteration_bounds = array<i64: 1>, scalar_prefetch = 0 : i64, scratch_operands = 0 : i64, tpu.core_type = #tpu.core_type<tc>, window_params = [{transform_indices = @transform_0, window_bounds = array<i64: 8, 32>}, {pipeline_mode = #tpu.pipeline_mode<synchronous>, transform_indices = @transform_1, window_bounds = array<i64: 8, 32>}, {transform_indices = @transform_2, window_bounds = array<i64: 1, 8, 128>}]} {
    %c8_i32 = arith.constant 8 : i32
    %0 = arith.muli %arg0, %c8_i32 : i32
    %c0 = arith.constant 0 : index
    %c0_0 = arith.constant 0 : index
    %1 = vector.load %arg1[%c0, %c0_0] : memref<8x32xf32, #tpu.memory_space<vmem>>, vector<8x32xf32>
    %c0_1 = arith.constant 0 : index
    %c0_2 = arith.constant 0 : index
    %2 = vector.load %arg2[%c0_1, %c0_2] : memref<8x32xf32, #tpu.memory_space<vmem>>, vector<8x32xf32>
    %cst = arith.constant dense<0.000000e+00> : vector<8x8xf32>
    %3 = tpu.matmul %1, %2, %cst {dimension_numbers = #tpu.dot_dimension_numbers<[1], [1], [0], [0], [0, 0, 1, 0], [], []>} : vector<8x32xf32>, vector<8x32xf32>, vector<8x8xf32> -> vector<8x8xf32>
    %4 = tpu.iota {dimensions = array<i32: 1>} : vector<8x8xi32>
    %5 = tpu.iota {dimensions = array<i32: 0>} : vector<8x1xi32>
    %6 = vector.broadcast %0 : i32 to vector<8x1xi32>
    %7 = arith.addi %6, %5 : vector<8x1xi32>
    %8 = vector.broadcast %7 : vector<8x1xi32> to vector<8x8xi32>
    %9 = arith.cmpi eq, %4, %8 : vector<8x8xi32>
    %cst_3 = arith.constant 0.000000e+00 : f32
    %10 = vector.broadcast %cst_3 : f32 to vector<8x8xf32>
    %11 = arith.select %9, %3, %10 : vector<8x8xi1>, vector<8x8xf32>
    %cst_4 = arith.constant dense<0.000000e+00> : vector<8xf32>
    %12 = vector.multi_reduction <add>, %11, %cst_4 [1] : vector<8x8xf32> to vector<8xf32>
    %13 = vector.shape_cast %12 : vector<8xf32> to vector<8x1xf32>
    %14 = vector.broadcast %13 : vector<8x1xf32> to vector<8x8xf32>
    %15 = arith.cmpf ogt, %3, %14 : vector<8x8xf32>
    %16 = arith.extui %15 : vector<8x8xi1> to vector<8x8xi32>
    %cst_5 = arith.constant dense<0> : vector<8xi32>
    %17 = vector.multi_reduction <add>, %16, %cst_5 [1] : vector<8x8xi32> to vector<8xi32>
    %18 = vector.shape_cast %17 : vector<8xi32> to vector<8x1xi32>
    %c8_i32_6 = arith.constant 8 : i32
    %19 = vector.broadcast %c8_i32_6 : i32 to vector<8x1xi32>
    %20 = arith.cmpi slt, %7, %19 : vector<8x1xi32>
    %21 = tpu.iota {dimensions = array<i32: 1>} : vector<8x128xi32>
    %cst_7 = arith.constant 0.000000e+00 : f32
    %22 = vector.broadcast %cst_7 : f32 to vector<8x128xf32>
    %c1_i32 = arith.constant 1 : i32
    %23 = vector.broadcast %c1_i32 : i32 to vector<8x1xi32>
    %24 = arith.cmpi slt, %18, %23 : vector<8x1xi32>
    %25 = arith.andi %20, %24 : vector<8x1xi1>
    %26 = arith.extui %25 : vector<8x1xi1> to vector<8x1xi32>
    %27 = vector.shape_cast %26 : vector<8x1xi32> to vector<1x8x1xi32>
    %cst_8 = arith.constant dense<0> : vector<1xi32>
    %28 = vector.multi_reduction <add>, %27, %cst_8 [1, 2] : vector<1x8x1xi32> to vector<1xi32>
    %29 = vector.shape_cast %28 : vector<1xi32> to vector<1x1x1xi32>
    %30 = vector.extract %29[0, 0, 0] : i32 from vector<1x1x1xi32>
    %31 = arith.sitofp %30 : i32 to f32
    %c0_i32 = arith.constant 0 : i32
    %32 = vector.broadcast %c0_i32 : i32 to vector<8x128xi32>
    %33 = arith.cmpi eq, %21, %32 : vector<8x128xi32>
    %cst_9 = arith.constant 0.000000e+00 : f32
    %34 = vector.broadcast %31 : f32 to vector<8x128xf32>
    %35 = vector.broadcast %cst_9 : f32 to vector<8x128xf32>
    %36 = arith.select %33, %34, %35 : vector<8x128xi1>, vector<8x128xf32>
    %37 = arith.addf %22, %36 : vector<8x128xf32>
    %c3_i32 = arith.constant 3 : i32
    %38 = vector.broadcast %c3_i32 : i32 to vector<8x1xi32>
    %39 = arith.cmpi slt, %18, %38 : vector<8x1xi32>
    %40 = arith.andi %20, %39 : vector<8x1xi1>
    %41 = arith.extui %40 : vector<8x1xi1> to vector<8x1xi32>
    %42 = vector.shape_cast %41 : vector<8x1xi32> to vector<1x8x1xi32>
    %cst_10 = arith.constant dense<0> : vector<1xi32>
    %43 = vector.multi_reduction <add>, %42, %cst_10 [1, 2] : vector<1x8x1xi32> to vector<1xi32>
    %44 = vector.shape_cast %43 : vector<1xi32> to vector<1x1x1xi32>
    %45 = vector.extract %44[0, 0, 0] : i32 from vector<1x1x1xi32>
    %46 = arith.sitofp %45 : i32 to f32
    %c1_i32_11 = arith.constant 1 : i32
    %47 = vector.broadcast %c1_i32_11 : i32 to vector<8x128xi32>
    %48 = arith.cmpi eq, %21, %47 : vector<8x128xi32>
    %cst_12 = arith.constant 0.000000e+00 : f32
    %49 = vector.broadcast %46 : f32 to vector<8x128xf32>
    %50 = vector.broadcast %cst_12 : f32 to vector<8x128xf32>
    %51 = arith.select %48, %49, %50 : vector<8x128xi1>, vector<8x128xf32>
    %52 = arith.addf %37, %51 : vector<8x128xf32>
    %c0_13 = arith.constant 0 : index
    %c0_14 = arith.constant 0 : index
    %c0_15 = arith.constant 0 : index
    %53 = vector.load %arg3[%c0_13, %c0_14, %c0_15] : memref<1x8x128xf32, #tpu.memory_space<vmem>>, vector<1x8x128xf32>
    %54 = vector.shape_cast %53 : vector<1x8x128xf32> to vector<8x128xf32>
    %55 = vector.shape_cast %52 : vector<8x128xf32> to vector<1x8x128xf32>
    tpu.vector_store %arg3[%c0_13, %c0_14, %c0_15], %55 {strides = array<i32>} : memref<1x8x128xf32, #tpu.memory_space<vmem>>, vector<1x8x128xf32>,
    return
  }
  func.func @transform_0(%arg0: i32) -> (i32, i32) {
    %c0_i32 = arith.constant 0 : i32
    %c0_i32_0 = arith.constant 0 : i32
    return %arg0, %c0_i32 : i32, i32
  }
  func.func @transform_1(%arg0: i32) -> (i32, i32) {
    %c0_i32 = arith.constant 0 : i32
    %c0_i32_0 = arith.constant 0 : i32
    %c0_i32_1 = arith.constant 0 : i32
    return %c0_i32, %c0_i32_0 : i32, i32
  }
  func.func @transform_2(%arg0: i32) -> (i32, i32, i32) {
    %c0_i32 = arith.constant 0 : i32
    %c0_i32_0 = arith.constant 0 : i32
    %c0_i32_1 = arith.constant 0 : i32
    return %arg0, %c0_i32, %c0_i32_0 : i32, i32, i32
  }
}

</mosaic_0001>

<bundles_post_ra>
// kernel: tpu_custom_call.1
= control target key start
LH: loop header
LB: loop body
LE: loop exit
PB: predicated region body
PF: predicated region fallthrough
CT: control target
= control target key end

     0   :  { %7 = vsyncpa [#allocation3], 0  ;;  %s263_s0 = inlined_call_operand.hbm [shape: f32[8,32], index: 0, kind: input, shape index: {}]   ;;  %s264_s1 = inlined_call_operand.hbm [shape: f32[8,32], index: 1, kind: input, shape index: {}]   ;;  %s265_s2 = inlined_call_operand.hbm [shape: f32[1,8,128], index: 2, kind: output, shape index: {}]  }
   0x1   :  { %8 = vsyncpa [#allocation6], 0 }
   0x2   :  { %9 = vsyncpa [#allocation4], 0  ;;  %s15_s11 = sshll.u32 %s263_s0, 4  ;;  %s235_s12 = smov [#allocation2]   ;;  %s16_s11 = int_to_ptr.hbm [resolvable:$true] %s15_s11 }
   0x3   :  { %s17_s13 = sshll.u32 %s235_s12, 4  ;;  %s26_s16 = sshll.u32 %s264_s1, 4  ;;  %s18_s13 = int_to_ptr.vmem [resolvable:$true] %s17_s13  ;;  %s27_s16 = int_to_ptr.hbm [resolvable:$true] %s26_s16 }
   0x4   :  { %20 = dma.hbm_to_vmem [thread:$0]  %s16_s11, 128, %s18_s13, [#allocation3]  }
   0x5   :  { %s236_s17 = smov [#allocation5]  }
   0x6   :  { %s28_s18 = sshll.u32 %s236_s17, 4  ;;  %s29_s18 = int_to_ptr.vmem [resolvable:$true] %s28_s18 }
   0x7   :  { %31 = dma.hbm_to_vmem [thread:$0]  %s27_s16, 128, %s29_s18, [#allocation6]  }
   0x8   :  { %229 = dma.done.wait [#allocation3], 128  }
   0x9   :  { %230 = vsyncadd [#allocation3], 4294967168 }
   0xa   :  { %231 = dma.done.wait [#allocation6], 128  }
   0xb   :  { %232 = vsyncadd [#allocation6], 4294967168  ;;  %vm43_vm0 = vcmask 261120   ;;  %v42_v0 = vld [vmem:[#allocation5] sm:$0xff]  ;;  %v41_v1 = vld [vmem:[#allocation2] sm:$0xff]  ;;  %v70_v2 = vlaneseq  ;;  %vm78_vm2 = vcmask 64512  }
   0xc   :  { %147 = vmatpush.xpose.msk.msra.mxu0 %vm43_vm0, %v42_v0  ;;  %v237_v9 = vmov 0   ;;  %s238_s21 = smov [#allocation7]   ;;  %s136_s25 = sshll.u32 %s265_s2, 4  ;;  %s137_s25 = int_to_ptr.hbm [resolvable:$true] %s136_s25 }
   0xd   :  { %v71_v3 = vand.u32 127, %v70_v2  ;;  %v73_v4 = vshrl.u32 %v70_v2, 7  ;;  %s134_s22 = sshll.u32 %s238_s21, 4  ;;  %s135_s22 = int_to_ptr.vmem [resolvable:$true] %s134_s22 }
   0xf   :  { %148 = vmatmul.msk.f32.vlgmr.msra.gmra.mxu0 %vm43_vm0, %v41_v1  ;;  %vm76_vm1 = vcmp.eq.s32.totalorder %v71_v3, %v73_v4  ;;  %vm109_vm6 = vcmp.eq.s32.totalorder %v71_v3, 0  ;;  %vm124_vm7 = vcmp.eq.s32.totalorder %v71_v3, 1 }
  0x8c   :  { %v67_v5 = vpop.f32.mrf.mxu0 }
  0x8d   :  { %v77_v6 = vsel %vm76_vm1, %v67_v5, 0.0 }
  0x8e   :  { %v79_v7 = vsel %vm78_vm2, %v77_v6, 0.0 }
  0x8f   :  { %80 = vadd.xlane.f32.xlu0 %v79_v7 }
 0x102   :  { %v81_v8 = vpop.xlane.xlu0 %80 }
 0x103   :  { %vm82_vm3 = vcmp.gt.f32.partialorder %v67_v5, %v81_v8 }
 0x104   :  { %v83_v10 = vsel %vm82_vm3, 1, %v237_v9 }
 0x105   :  { %v84_v11 = vsel %vm78_vm2, %v83_v10, 0 }
 0x106   :  { %v86_v12 = vshrl.u32 %v84_v11, 16  ;;  %v85_v13 = vand.u32 65535, %v84_v11 }
 0x108   :  { %v88_v14 = vcvt.s32.f32 %v86_v12  ;;  %v87_v15 = vcvt.s32.f32 %v85_v13 }
 0x10a   :  { %91 = vadd.xlane.f32.xlu0 %v88_v14  ;;  %89 = vadd.xlane.f32.xlu1 %v87_v15 }
 0x17d   :  { %v92_v16 = vpop.xlane.xlu0 %91  ;;  %v90_v17 = vpop.xlane.xlu1 %89 }
 0x17e   :  { %v94_v18 = vcvt.f32.s32 %v92_v16  ;;  %v93_v20 = vcvt.f32.s32 %v90_v17 }
 0x180   :  { %v95_v19 = vshll.u32 %v94_v18, 16 }
 0x182   :  { %v96_v21 = vadd.s32 %v95_v19, %v93_v20 }
 0x184   :  { %vm98_vm4 = vcmp.lt.s32.totalorder %v96_v21, 1  ;;  %vm113_vm5 = vcmp.lt.s32.totalorder %v96_v21, 3 }
 0x185   :  { %v100_v22 = vsel %vm98_vm4, 1, %v237_v9  ;;  %v115_v23 = vsel %vm113_vm5, 1, %v237_v9 }
 0x186   :  { %v101_v24 = vrot.slane %v100_v22, 4  ;;  %v116_v25 = vrot.slane %v115_v23, 4 }
 0x188   :  { %v102_v26 = vadd.s32 %v101_v24, %v100_v22  ;;  %v117_v27 = vadd.s32 %v116_v25, %v115_v23 }
 0x18a   :  { %v103_v28 = vrot.slane %v102_v26, 2  ;;  %v118_v29 = vrot.slane %v117_v27, 2 }
 0x18c   :  { %v104_v30 = vadd.s32 %v103_v28, %v102_v26  ;;  %v119_v31 = vadd.s32 %v118_v29, %v117_v27 }
 0x18e   :  { %v105_v32 = vrot.slane %v104_v30, 1  ;;  %v120_v33 = vrot.slane %v119_v31, 1 }
 0x190   :  { %v106_v34 = vadd.s32 %v105_v32, %v104_v30  ;;  %v121_v35 = vadd.s32 %v120_v33, %v119_v31 }
 0x192   :  { %149 = vpush %v106_v34 }
 0x193   :  { %151 = vpush %v121_v35 }
 0x1c3   :  { %s150_s0 = spop %149 }
 0x1c4   :  { %s108_s1 = scvt.s32.f32 %s150_s0  ;;  %s152_s19 = spop %151 }
 0x1c5   :  { %s123_s20 = scvt.s32.f32 %s152_s19 }
 0x1c6   :  { %v110_v36 = vstv %s108_s1 }
 0x1c7   :  { %v111_v37 = vsel %vm109_vm6, %v110_v36, 0.0  ;;  %v125_v38 = vstv %s123_s20 }
 0x1c8   :  { %v126_v39 = vsel %vm124_vm7, %v125_v38, 0.0 }
 0x1c9   :  { %v127_v40 = vadd.f32 %v126_v39, %v111_v37 }
 0x1cb   :  { %128 = vst [vmem:[#allocation7] sm:$0xff] %v127_v40 }
 0x1cc   :  { %139 = dma.vmem_to_hbm [thread:$0]  %s135_s22, 128, %s137_s25, [#allocation4]  }
 0x1cd   :  { %233 = dma.done.wait [#allocation4], 128  }
 0x1ce   :  { %234 = vsyncadd [#allocation4], 4294967168 }
 0x1cf   :  { %144 = vsyncpa [#allocation3], 1 }
 0x1d0   :  { %145 = vsyncpa [#allocation6], 1 }
 0x1d1   :  { %146 = vsyncpa [#allocation4], 1 }

</bundles_post_ra>
